<compile_context>
chip_gen: v5e
topology: v5e:2x2
jax: 0.10.0
libtpu: 0.0.40
codegen_flags: <defaults>
</compile_context>

<pallas_src>
import jax
import jax.numpy as jnp
from jax.experimental import pallas as pl
from jax.experimental.pallas import tpu as pltpu

_LANES = 128
_SUBLANES = 8


def _round_up(x: int, m: int) -> int:
    return ((x + m - 1) // m) * m


def _barycenter_kernel(x_ref, w_ref, o_ref):
    # x_ref: (TM, T) row tile, native dtype (f32 or bf16)
    # w_ref: (T, 1)  pre-normalized weight column, same dtype as x
    # o_ref: (1, TM) lane-dense output row tile
    col = jnp.dot(x_ref[...], w_ref[...],
                  preferred_element_type=jnp.float32)        # (TM, 1) on the MXU
    # Relayout only the tiny per-tile result column to a lane-dense row.
    o_ref[...] = col.reshape(1, -1).astype(o_ref.dtype)


def _choose_tile_rows(M: int, T: int, itemsize: int,
                      per_buffer_budget: int = 4 * 1024 * 1024) -> int:
    """Rows of the flattened (M, T) input per grid step.

    Sized from the *padded* VMEM footprint: the last dim pads to 128 lanes, so
    one input buffer is TM * round_up(T, 128) * itemsize bytes.  A <=4 MiB
    per-buffer budget keeps 2x input + 2x output + headroom ~<= 10 MiB, under
    the scoped-VMEM default of every generation (v5e's 16 MiB included).
    """
    if M <= _LANES:
        return M  # single block equal to the full array dims

    padded_row_bytes = _round_up(T, _LANES) * itemsize
    tm = (per_buffer_budget // padded_row_bytes) // _LANES * _LANES
    tm = max(tm, _LANES)
    tm = min(tm, max(_LANES, (M // _LANES) * _LANES))

    # Prefer >= 8 grid steps (deep DMA pipeline, megacore sharding) while
    # keeping tiles >= 512 rows (measured HBM-roofline plateau).
    while pl.cdiv(M, tm) < 8 and tm >= 1024:
        tm = (tm // 2 // _LANES) * _LANES
    # Guarantee >= 2 steps so both of v7x's TensorCores get work.
    if pl.cdiv(M, tm) < 2 and tm > _LANES:
        tm = max(_LANES, (tm // 2 // _LANES) * _LANES)
    return tm


def _vmem_bytes(tm: int, M: int, T: int, itemsize: int) -> int:
    """Padded resident-VMEM estimate: 2x input + 2x output + weight."""
    t_pad = _round_up(T, _LANES)
    in_tile = _round_up(tm, _SUBLANES) * t_pad * itemsize
    out_tile = _SUBLANES * _round_up(min(tm, max(M, 1)), _LANES) * itemsize
    w_tile = _round_up(T, _SUBLANES) * _LANES * itemsize
    return 2 * in_tile + 2 * out_tile + w_tile


def barycenter(x: jax.Array, weight: jax.Array) -> jax.Array:
    """x: (B, N, T) float32/bfloat16, weight: (T, 1) -> (B, N, 1) in x.dtype."""
    B, N, T = x.shape
    assert weight.shape == (T, 1)
    M = B * N
    itemsize = jnp.dtype(x.dtype).itemsize

    # Hoisted normalization: tiny (T,) op done once, outside the grid loop.
    w_f32 = weight.astype(jnp.float32)
    w_col = (w_f32 / jnp.sum(w_f32)).astype(x.dtype).reshape(T, 1)

    # Free contiguous reshape: collapse batch into rows.
    x2 = x.reshape(M, T)

    tm = _choose_tile_rows(M, T, itemsize)
    grid = (pl.cdiv(M, tm),)

    needed = _vmem_bytes(tm, M, T, itemsize)
    vmem_limit = max(32 * 1024 * 1024, int(needed * 1.25))

    out_row = pl.pallas_call(
        _barycenter_kernel,
        out_shape=jax.ShapeDtypeStruct((1, M), x.dtype),
        grid_spec=pltpu.PrefetchScalarGridSpec(
            num_scalar_prefetch=0,
            grid=grid,
            in_specs=[
                pl.BlockSpec((tm, T), lambda j: (j, 0)),   # row tile
                pl.BlockSpec((T, 1), lambda j: (0, 0)),    # weight, fetched once
            ],
            out_specs=pl.BlockSpec((1, tm), lambda j: (0, j)),  # lane-dense
        ),
        compiler_params=pltpu.CompilerParams(
            dimension_semantics=("parallel",),
            vmem_limit_bytes=vmem_limit,
        ),
        cost_estimate=pl.CostEstimate(
            flops=2 * M * T,
            transcendentals=0,
            bytes_accessed=itemsize * (M * T + M + T),
        ),
    )(x2, w_col)

    return out_row.reshape(B, N, 1)


if __name__ == "__main__":
    key = jax.random.PRNGKey(0)
    kx, kw, kx2, kx3 = jax.random.split(key, 4)

    # 1) Module default init (uniform weight == mean), small shapes as in the
    #    docstring-style example: Barycenter((N, T)) with x (B, N, T).
    B, N, T = 2, 16, 32
    x = jax.random.normal(kx, (B, N, T), dtype=jnp.float32)
    weight = jnp.ones((T, 1), dtype=jnp.float32) / T
    out = jax.block_until_ready(barycenter(x, weight))
    ref = jnp.mean(x, axis=2, keepdims=True)
    assert out.shape == (B, N, 1)
    assert jnp.abs(out - ref).sum() < 1e-4

    # 2) Non-uniform weight, shapes that exercise a multi-step grid and a
    #    partial (masked) last row tile.
    B2, N2, T2 = 2, 300, 96
    x2 = jax.random.normal(kx2, (B2, N2, T2), dtype=jnp.float32)
    w2 = jnp.abs(jax.random.normal(kw, (T2, 1), dtype=jnp.float32)) + 0.1
    out2 = jax.block_until_ready(barycenter(x2, w2))
    ref2 = jnp.einsum("bnt,to->bno", x2, w2 / jnp.sum(w2))
    assert out2.shape == (B2, N2, 1)
    assert jnp.max(jnp.abs(out2 - ref2)) < 1e-3

    # 3) bf16 inputs accepted directly (f32 accumulation in-kernel).
    B3, N3, T3 = 2, 64, 128
    x3 = jax.random.normal(kx3, (B3, N3, T3), dtype=jnp.float32)
    x3_bf16 = x3.astype(jnp.bfloat16)
    w3 = jnp.ones((T3, 1), dtype=jnp.float32) / T3
    out3 = jax.block_until_ready(barycenter(x3_bf16, w3))
    ref3 = jnp.mean(x3_bf16.astype(jnp.float32), axis=2, keepdims=True)
    assert out3.shape == (B3, N3, 1)
    assert jnp.max(jnp.abs(out3.astype(jnp.float32) - ref3)) < 5e-2

    print("KERNEL_OK")
</pallas_src>

<mosaic_0001>
module attributes {stable_mosaic.version = 11 : i64} {
  func.func @_barycenter_kernel(%arg0: i32, %arg1: memref<32x32xf32, #tpu.memory_space<vmem>>, %arg2: memref<32x1xf32, #tpu.memory_space<vmem>>, %arg3: memref<1x32xf32, #tpu.memory_space<vmem>>) attributes {dimension_semantics = [#tpu.dimension_semantics<parallel>], iteration_bounds = array<i64: 1>, scalar_prefetch = 0 : i64, scratch_operands = 0 : i64, tpu.core_type = #tpu.core_type<tc>, window_params = [{transform_indices = @transform_0, window_bounds = array<i64: 32, 32>}, {pipeline_mode = #tpu.pipeline_mode<synchronous>, transform_indices = @transform_1, window_bounds = array<i64: 32, 1>}, {transform_indices = @transform_2, window_bounds = array<i64: 1, 32>}]} {
    %c0 = arith.constant 0 : index
    %c0_0 = arith.constant 0 : index
    %0 = vector.load %arg1[%c0, %c0_0] : memref<32x32xf32, #tpu.memory_space<vmem>>, vector<32x32xf32>
    %c0_1 = arith.constant 0 : index
    %c0_2 = arith.constant 0 : index
    %1 = vector.load %arg2[%c0_1, %c0_2] : memref<32x1xf32, #tpu.memory_space<vmem>>, vector<32x1xf32>
    %cst = arith.constant dense<0.000000e+00> : vector<32x1xf32>
    %2 = tpu.matmul %0, %1, %cst {dimension_numbers = #tpu.dot_dimension_numbers<[1], [0], [0], [1], [0, 0, 1, 1], [], []>} : vector<32x32xf32>, vector<32x1xf32>, vector<32x1xf32> -> vector<32x1xf32>
    %3 = vector.shape_cast %2 : vector<32x1xf32> to vector<1x32xf32>
    %c0_3 = arith.constant 0 : index
    %c0_4 = arith.constant 0 : index
    %4 = vector.load %arg3[%c0_3, %c0_4] : memref<1x32xf32, #tpu.memory_space<vmem>>, vector<1x32xf32>
    tpu.vector_store %arg3[%c0_3, %c0_4], %3 {strides = array<i32>} : memref<1x32xf32, #tpu.memory_space<vmem>>, vector<1x32xf32>,
    return
  }
  func.func @transform_0(%arg0: i32) -> (i32, i32) {
    %c0_i32 = arith.constant 0 : i32
    %c0_i32_0 = arith.constant 0 : i32
    return %arg0, %c0_i32 : i32, i32
  }
  func.func @transform_1(%arg0: i32) -> (i32, i32) {
    %c0_i32 = arith.constant 0 : i32
    %c0_i32_0 = arith.constant 0 : i32
    %c0_i32_1 = arith.constant 0 : i32
    return %c0_i32, %c0_i32_0 : i32, i32
  }
  func.func @transform_2(%arg0: i32) -> (i32, i32) {
    %c0_i32 = arith.constant 0 : i32
    %c0_i32_0 = arith.constant 0 : i32
    return %c0_i32, %arg0 : i32, i32
  }
}

</mosaic_0001>

<bundles_post_ra>
// kernel: tpu_custom_call.1
= control target key start
LH: loop header
LB: loop body
LE: loop exit
PB: predicated region body
PF: predicated region fallthrough
CT: control target
= control target key end

     0   :  { %s202_s0 = inlined_call_operand.vmem [shape: f32[32,32], index: 0, kind: input, shape index: {}]   ;;  %s203_s1 = inlined_call_operand.vmem [shape: f32[32,1], index: 1, kind: input, shape index: {}]   ;;  %s204_s2 = inlined_call_operand.hbm [shape: f32[1,32], index: 2, kind: output, shape index: {}]  }
   0x1   :  { %v19_v0 = vld [vmem:[%s203_s1 + $0x18] sm:$0xff]  ;;  %v18_v1 = vld [vmem:[%s203_s1 + $0x10] sm:$0xff]  ;;  %v17_v2 = vld [vmem:[%s203_s1 + $0x8] sm:$0xff] }
   0x2   :  { %45 = vmatpush.msra.mxu0 %v19_v0  ;;  %117 = vmatpush.msra.mxu2 %v19_v0 }
   0x3   :  { %116 = vmatpush.msra.mxu1 %v19_v0  ;;  %118 = vmatpush.msra.mxu3 %v19_v0 }
   0x4   :  { %7 = vsyncpa [#allocation3], 0  ;;  %46 = vmatpush.msra.mxu0 %v18_v1  ;;  %120 = vmatpush.msra.mxu2 %v18_v1  ;;  %v16_v3 = vld [vmem:[%s203_s1] sm:$0xff]  ;;  %vm20_vm0 = vcmask 261120   ;;  %v14_v5 = vld [vmem:[%s202_s0 + $0x10] sm:$0xff]  ;;  %v158_v8 = vmov 0   ;;  %v78_v13 = vlaneseq }
   0x5   :  { %119 = vmatpush.msra.mxu1 %v18_v1  ;;  %121 = vmatpush.msra.mxu3 %v18_v1  ;;  %v12_v4 = vld [vmem:[%s202_s0] sm:$0xff]  ;;  %v13_v6 = vld [vmem:[%s202_s0 + $0x8] sm:$0xff]  ;;  %v15_v7 = vld [vmem:[%s202_s0 + $0x18] sm:$0xff]  ;;  %vm83_vm1 = vcmask 130112   ;;  %vm87_vm2 = vcmask 195712   ;;  %s159_s0 = smov [#allocation2]  }
   0x6   :  { %47 = vmatpush.msra.mxu0 %v17_v2  ;;  %123 = vmatpush.msra.mxu2 %v17_v2  ;;  %v79_v15 = vand.u32 127, %v78_v13  ;;  %s101_s24 = sshll.u32 %s159_s0, 4  ;;  %s103_s27 = sshll.u32 %s204_s2, 4  ;;  %vm91_vm3 = vcmask 261312   ;;  %vm94_vm4 = vcmask 253952   ;;  %s102_s24 = int_to_ptr.vmem [resolvable:$true] %s101_s24  ;;  %s104_s27 = int_to_ptr.hbm [resolvable:$true] %s103_s27 }
   0x7   :  { %122 = vmatpush.msra.mxu1 %v17_v2  ;;  %124 = vmatpush.msra.mxu3 %v17_v2 }
   0x8   :  { %48 = vmatpush.msra.mxu0 %v16_v3  ;;  %126 = vmatpush.msra.mxu2 %v16_v3  ;;  %v81_v16 = vadd.s32 4294967288, %v79_v15  ;;  %v85_v20 = vadd.s32 4294967280, %v79_v15  ;;  %v89_v22 = vadd.s32 4294967272, %v79_v15 }
   0x9   :  { %112 = vmatmul.msk.f32.vlgmr.msra.gmra.mxu0 %vm20_vm0, %v12_v4  ;;  %114 = vmatmul.msk.f32.vlgmr.msra.gmra.mxu2 %vm20_vm0, %v14_v5 }
   0xa   :  { %125 = vmatpush.msra.mxu1 %v16_v3  ;;  %127 = vmatpush.msra.mxu3 %v16_v3 }
   0xb   :  { %113 = vmatmul.msk.f32.vlgmr.msra.gmra.mxu1 %vm20_vm0, %v13_v6  ;;  %115 = vmatmul.msk.f32.vlgmr.msra.gmra.mxu3 %vm20_vm0, %v15_v7 }
   0xc   :  { %130 = vset.pattern.permute.xlu0 %v158_v8  ;;  %131 = vset.pattern.permute.xlu1 %v158_v8 }
  0x86   :  { %v50_v9 = vpop.f32.mrf.mxu0 }
  0x87   :  { %67 = vperm.xlu0 %130, %v50_v9  }
  0x88   :  { %v53_v11 = vpop.f32.mrf.mxu1 }
  0x8c   :  { %v56_v10 = vpop.f32.mrf.mxu2 }
  0x8d   :  { %73 = vperm.xlu1 %131, %v56_v10  }
  0x8e   :  { %v59_v12 = vpop.f32.mrf.mxu3 }
  0x8f   :  { %70 = vperm.xlu0 %130, %v53_v11  }
  0x95   :  { %76 = vperm.xlu1 %131, %v59_v12  }
  0xf9   :  { %v68_v14 = vpop.permute.xlu0 %67 }
  0xfa   :  { %v80_v21 = vperm.slane %v68_v14, %v79_v15 }
  0xff   :  { %v74_v17 = vpop.permute.xlu1 %73 }
 0x100   :  { %v86_v24 = vperm.slane %v74_v17, %v85_v20 }
 0x101   :  { %v71_v18 = vpop.permute.xlu0 %70 }
 0x102   :  { %v82_v19 = vperm.slane %v71_v18, %v81_v16 }
 0x104   :  { %v84_v23 = vsel %vm83_vm1, %v82_v19, %v80_v21 }
 0x105   :  { %v88_v27 = vsel %vm87_vm2, %v86_v24, %v84_v23 }
 0x107   :  { %v77_v25 = vpop.permute.xlu1 %76 }
 0x108   :  { %v90_v26 = vperm.slane %v77_v25, %v89_v22 }
 0x10a   :  { %v92_v28 = vsel %vm91_vm3, %v90_v26, %v88_v27 }
 0x10b   :  { %95 = vst.msk [vmem:[#allocation2] sm:$0x1] %vm94_vm4, %v92_v28 }
 0x10c   :  { %106 = dma.vmem_to_hbm [thread:$0]  %s102_s24, 16, %s104_s27, [#allocation3]  }
 0x10d   :  { %156 = dma.done.wait [#allocation3], 16  }
 0x10e   :  { %157 = vsyncadd [#allocation3], 4294967280 }
 0x10f   :  { %111 = vsyncpa [#allocation3], 1 }

</bundles_post_ra>
